<compile_context>
chip_gen: v7x
topology: tpu7x:2x2x1
jax: 0.10.0
libtpu: 0.0.40
codegen_flags: <defaults>
</compile_context>

<pallas_src>
import jax
import jax.numpy as jnp
from jax.experimental import pallas as pl
from jax.experimental.pallas import tpu as pltpu


def _round_up(x, m):
    return ((x + m - 1) // m) * m


def _cheby_kernel(x_ref, d_ref, w_ref, b_ref, o_ref):
    """One row tile: o = relu(concat([d*x, c1*x, c2*x, x]) @ W + b).

    x_ref: (TILE_R, D_in)        f32 node features (rows of B*N, b-major)
    d_ref: (TILE_R, 1)           f32 per-row diag(L)
    w_ref: (4*D_in, D_out_p)     bf16 folded filter weight (VMEM-resident, single copy)
    b_ref: (1, D_out_p)          f32 bias (VMEM-resident)
    o_ref: (TILE_R, D_out_p)     f32 output
    """
    x = x_ref[...]                               # f32, stays in vregs
    d = d_ref[...]                               # (TILE_R, 1) f32
    c1 = 2.0 * d * d - 1.0                       # T1 coefficient (2d^2 - 1)
    c2 = (4.0 * d * d - 3.0) * d                 # T2 coefficient (4d^3 - 3d)

    # Build the K = 4*D_in operand once (single bf16 cast), single MXU matmul
    # with f32 accumulation inside the systolic array.
    feat = jnp.concatenate([d * x, c1 * x, c2 * x, x], axis=-1)
    acc = jnp.dot(feat.astype(jnp.bfloat16), w_ref[...],
                  preferred_element_type=jnp.float32)
    acc = acc + b_ref[...]
    # Fused ReLU; dropout is identity (eval mode).
    o_ref[...] = jnp.maximum(acc, 0.0)


def _vmem_capacity_bytes():
    try:
        return int(pltpu.get_tpu_info().vmem_capacity_bytes)
    except Exception:
        return 64 << 20  # conservative (v7x per-TC VMEM)


def cheby_net_cell(node_feat, L, weight, bias, *, tile_rows=2048):
    """ChebyNetcell forward.

    node_feat: (B, N, D_in) f32
    L:         (N, N) f32          (only diag(L) is used, matching the einsum)
    weight:    (5*D_in, D_out) f32 (Linear weight, pre-transposed: y = x @ W + b)
    bias:      (D_out,) f32
    returns    (B, N, D_out) f32
    """
    B, N, D_in = node_feat.shape
    K5, D_out = weight.shape
    assert K5 == 5 * D_in, "filter expects 5*D_in input features (see module note)"
    rows = B * N

    # --- wrapper-side prep (cheap, no O(N^2) Laplacian DMA) -----------------
    dvec = jnp.diagonal(L).astype(jnp.float32).reshape(N, 1)     # (N, 1)
    d_rows = jnp.tile(dvec, (B, 1))                              # (B*N, 1), b-major
    x = node_feat.reshape(rows, D_in).astype(jnp.float32)        # (B*N, D_in)

    # Fold the duplicate (d*x) block (edge-type copy == T0): W0 + W1.
    w = weight.astype(jnp.float32)
    w_folded = jnp.concatenate(
        [w[0:D_in] + w[D_in:2 * D_in], w[2 * D_in:]], axis=0)    # (4*D_in, D_out)

    # Pad D_out to a lane-dense multiple of 128 only when needed.
    d_out_p = D_out if D_out % 128 == 0 else _round_up(D_out, 128)
    if d_out_p != D_out:
        w_folded = jnp.pad(w_folded, ((0, 0), (0, d_out_p - D_out)))
        b_pad = jnp.pad(bias.astype(jnp.float32), (0, d_out_p - D_out))
    else:
        b_pad = bias.astype(jnp.float32)
    w_folded = w_folded.astype(jnp.bfloat16)
    b_pad = b_pad.reshape(1, d_out_p)

    # --- tile size: generation-aware VMEM budget -----------------------------
    def lanes(n):
        return _round_up(max(n, 128), 128)

    w_resident = _round_up(4 * D_in, 16) * lanes(d_out_p) * 2    # bf16, single copy
    b_resident = 8 * lanes(d_out_p) * 4

    def _vmem_bytes(tr):
        x_b = 2 * tr * lanes(D_in) * 4        # double-buffered f32 input tile
        d_b = 2 * tr * 128 * 4                # (tr,1) pads to one lane group
        o_b = 2 * tr * lanes(d_out_p) * 4     # double-buffered f32 output tile
        return x_b + d_b + o_b + w_resident + b_resident

    cap = _vmem_capacity_bytes()
    budget = int(cap * 0.55)                  # ~35 MiB on v7x, ~70 MiB on v5e/v6e

    tile_r = min(_round_up(tile_rows, 8), _round_up(rows, 8))
    tile_r = max(8, (tile_r // 8) * 8)
    while tile_r > 8 and _vmem_bytes(tile_r) > budget:
        tile_r = max(8, ((tile_r // 2) // 8) * 8)

    grid = (pl.cdiv(rows, tile_r),)           # ragged last block handled by Pallas

    vmem_limit = min(cap - (4 << 20),
                     max(_vmem_bytes(tile_r) + (8 << 20), 32 << 20))

    out = pl.pallas_call(
        _cheby_kernel,
        out_shape=jax.ShapeDtypeStruct((rows, d_out_p), jnp.float32),
        grid_spec=pltpu.PrefetchScalarGridSpec(
            num_scalar_prefetch=0,
            grid=grid,
            in_specs=[
                pl.BlockSpec((tile_r, D_in), lambda i: (i, 0)),
                pl.BlockSpec((tile_r, 1), lambda i: (i, 0)),
                # Whole-array VMEM residency: single-buffered, DMA'd once.
                pl.BlockSpec(memory_space=pltpu.MemorySpace.VMEM),
                pl.BlockSpec(memory_space=pltpu.MemorySpace.VMEM),
            ],
            out_specs=pl.BlockSpec((tile_r, d_out_p), lambda i: (i, 0)),
        ),
        compiler_params=pltpu.CompilerParams(
            dimension_semantics=("parallel",),     # megacore / v7x 2-TC sharding
            vmem_limit_bytes=int(vmem_limit),
        ),
    )(x, d_rows, w_folded, b_pad)

    if d_out_p != D_out:
        out = out[:, :D_out]
    return out.reshape(B, N, D_out)


def _reference(node_feat, L, weight, bias):
    """Pure-JAX reference of the (5-block) forward, eval mode, f32."""
    d = jnp.diagonal(L)[None, :, None]
    x = node_feat
    t0 = d * x
    t1 = 2.0 * d * t0 - x
    t2 = 2.0 * d * t1 - t0
    msg = jnp.concatenate([d * x, t0, t1, t2, x], axis=-1)
    return jnp.maximum(msg @ weight + bias, 0.0)   # dropout identity in eval


if __name__ == "__main__":
    B, N, D_IN, D_OUT = 2, 16, 8, 32
    key = jax.random.PRNGKey(0)
    k1, k2, k3, k4 = jax.random.split(key, 4)
    node_feat = jax.random.normal(k1, (B, N, D_IN), dtype=jnp.float32)
    L = 0.4 * jax.random.normal(k2, (N, N), dtype=jnp.float32)
    # Filter uses in_features = 5*D_in (what the forward actually produces).
    weight = jax.random.normal(k3, (5 * D_IN, D_OUT), dtype=jnp.float32) / jnp.sqrt(5.0 * D_IN)
    bias = 0.1 * jax.random.normal(k4, (D_OUT,), dtype=jnp.float32)

    out = cheby_net_cell(node_feat, L, weight, bias)
    out = jax.block_until_ready(out)

    ref = _reference(node_feat, L, weight, bias)
    err = float(jnp.max(jnp.abs(out - ref)) / (jnp.max(jnp.abs(ref)) + 1e-6))
    assert out.shape == (B, N, D_OUT)
    assert err < 5e-2, f"max normalized error too large: {err}"
    print("KERNEL_OK")
</pallas_src>

<mosaic_0001>
module attributes {stable_mosaic.version = 11 : i64} {
  func.func @_cheby_kernel(%arg0: i32, %arg1: memref<32x8xf32, #tpu.memory_space<vmem>>, %arg2: memref<32x1xf32, #tpu.memory_space<vmem>>, %arg3: memref<32x128xbf16, #tpu.memory_space<vmem>>, %arg4: memref<1x128xf32, #tpu.memory_space<vmem>>, %arg5: memref<32x128xf32, #tpu.memory_space<vmem>>) attributes {dimension_semantics = [#tpu.dimension_semantics<parallel>], iteration_bounds = array<i64: 1>, scalar_prefetch = 0 : i64, scratch_operands = 0 : i64, tpu.core_type = #tpu.core_type<tc>, window_params = [{transform_indices = @transform_0, window_bounds = array<i64: 32, 8>}, {transform_indices = @transform_1, window_bounds = array<i64: 32, 1>}, {pipeline_mode = #tpu.pipeline_mode<synchronous>, transform_indices = @transform_2, window_bounds = array<i64: 32, 128>}, {pipeline_mode = #tpu.pipeline_mode<synchronous>, transform_indices = @transform_3, window_bounds = array<i64: 1, 128>}, {transform_indices = @transform_4, window_bounds = array<i64: 32, 128>}]} {
    %c0 = arith.constant 0 : index
    %c0_0 = arith.constant 0 : index
    %0 = vector.load %arg1[%c0, %c0_0] : memref<32x8xf32, #tpu.memory_space<vmem>>, vector<32x8xf32>
    %c0_1 = arith.constant 0 : index
    %c0_2 = arith.constant 0 : index
    %1 = vector.load %arg2[%c0_1, %c0_2] : memref<32x1xf32, #tpu.memory_space<vmem>>, vector<32x1xf32>
    %cst = arith.constant 2.000000e+00 : f32
    %2 = vector.broadcast %cst : f32 to vector<32x1xf32>
    %3 = arith.mulf %2, %1 : vector<32x1xf32>
    %4 = arith.mulf %3, %1 : vector<32x1xf32>
    %cst_3 = arith.constant 1.000000e+00 : f32
    %5 = vector.broadcast %cst_3 : f32 to vector<32x1xf32>
    %6 = arith.subf %4, %5 : vector<32x1xf32>
    %cst_4 = arith.constant 4.000000e+00 : f32
    %7 = vector.broadcast %cst_4 : f32 to vector<32x1xf32>
    %8 = arith.mulf %7, %1 : vector<32x1xf32>
    %9 = arith.mulf %8, %1 : vector<32x1xf32>
    %cst_5 = arith.constant 3.000000e+00 : f32
    %10 = vector.broadcast %cst_5 : f32 to vector<32x1xf32>
    %11 = arith.subf %9, %10 : vector<32x1xf32>
    %12 = arith.mulf %11, %1 : vector<32x1xf32>
    %13 = vector.broadcast %1 : vector<32x1xf32> to vector<32x8xf32>
    %14 = arith.mulf %13, %0 : vector<32x8xf32>
    %15 = vector.broadcast %6 : vector<32x1xf32> to vector<32x8xf32>
    %16 = arith.mulf %15, %0 : vector<32x8xf32>
    %17 = vector.broadcast %12 : vector<32x1xf32> to vector<32x8xf32>
    %18 = arith.mulf %17, %0 : vector<32x8xf32>
    %19 = tpu.concatenate %14, %16, %18, %0 in 1 : vector<32x8xf32>, vector<32x8xf32>, vector<32x8xf32>, vector<32x8xf32> -> vector<32x32xf32>
    %20 = arith.truncf %19 : vector<32x32xf32> to vector<32x32xbf16>
    %c0_6 = arith.constant 0 : index
    %c0_7 = arith.constant 0 : index
    %21 = vector.load %arg3[%c0_6, %c0_7] : memref<32x128xbf16, #tpu.memory_space<vmem>>, vector<32x128xbf16>
    %cst_8 = arith.constant dense<0.000000e+00> : vector<32x128xf32>
    %22 = tpu.matmul %20, %21, %cst_8 {dimension_numbers = #tpu.dot_dimension_numbers<[1], [0], [0], [1], [0, 0, 1, 1], [], []>} : vector<32x32xbf16>, vector<32x128xbf16>, vector<32x128xf32> -> vector<32x128xf32>
    %c0_9 = arith.constant 0 : index
    %c0_10 = arith.constant 0 : index
    %23 = vector.load %arg4[%c0_9, %c0_10] : memref<1x128xf32, #tpu.memory_space<vmem>>, vector<1x128xf32>
    %24 = vector.broadcast %23 : vector<1x128xf32> to vector<32x128xf32>
    %25 = arith.addf %22, %24 : vector<32x128xf32>
    %cst_11 = arith.constant 0.000000e+00 : f32
    %26 = vector.broadcast %cst_11 : f32 to vector<32x128xf32>
    %27 = arith.maximumf %25, %26 : vector<32x128xf32>
    %c0_12 = arith.constant 0 : index
    %c0_13 = arith.constant 0 : index
    %28 = vector.load %arg5[%c0_12, %c0_13] : memref<32x128xf32, #tpu.memory_space<vmem>>, vector<32x128xf32>
    tpu.vector_store %arg5[%c0_12, %c0_13], %27 {strides = array<i32>} : memref<32x128xf32, #tpu.memory_space<vmem>>, vector<32x128xf32>,
    return
  }
  func.func @transform_0(%arg0: i32) -> (i32, i32) {
    %c0_i32 = arith.constant 0 : i32
    %c0_i32_0 = arith.constant 0 : i32
    return %arg0, %c0_i32 : i32, i32
  }
  func.func @transform_1(%arg0: i32) -> (i32, i32) {
    %c0_i32 = arith.constant 0 : i32
    %c0_i32_0 = arith.constant 0 : i32
    return %arg0, %c0_i32 : i32, i32
  }
  func.func @transform_2(%arg0: i32) -> (i32, i32) {
    %c0_i32 = arith.constant 0 : i32
    %c0_i32_0 = arith.constant 0 : i32
    %c0_i32_1 = arith.constant 0 : i32
    return %c0_i32, %c0_i32_0 : i32, i32
  }
  func.func @transform_3(%arg0: i32) -> (i32, i32) {
    %c0_i32 = arith.constant 0 : i32
    %c0_i32_0 = arith.constant 0 : i32
    %c0_i32_1 = arith.constant 0 : i32
    return %c0_i32, %c0_i32_0 : i32, i32
  }
  func.func @transform_4(%arg0: i32) -> (i32, i32) {
    %c0_i32 = arith.constant 0 : i32
    %c0_i32_0 = arith.constant 0 : i32
    return %arg0, %c0_i32 : i32, i32
  }
}

</mosaic_0001>

<bundles_post_ra>
// kernel: tpu_custom_call.1
= control target key start
LH: loop header
LB: loop body
LE: loop exit
PB: predicated region body
PF: predicated region fallthrough
CT: control target
= control target key end

     0   :  { %v384_v3 = vmov 0   ;;  %s489_s0 = inlined_call_operand.vmem [shape: f32[32,8], index: 0, kind: input, shape index: {}]   ;;  %s490_s1 = inlined_call_operand.vmem [shape: f32[32,1], index: 1, kind: input, shape index: {}]   ;;  %s491_s2 = inlined_call_operand.vmem [shape: bf16[32,128], index: 2, kind: input, shape index: {}]   ;;  %s492_s3 = inlined_call_operand.vmem [shape: f32[1,128], index: 3, kind: input, shape index: {}]   ;;  %s493_s4 = inlined_call_operand.hbm [shape: f32[32,128], index: 4, kind: output, shape index: {}]  }
   0x1   :  { %v25_v0 = vld [vmem:[%s490_s1 + $0x10] sm:$0xff]  ;;  %v23_v1 = vld [vmem:[%s490_s1] sm:$0xff]  ;;  %v26_v2 = vld [vmem:[%s490_s1 + $0x18] sm:$0xff]  ;;  %327 = vset.pattern.permute.xlu1 %v384_v3  ;;  %326 = vset.pattern.permute.xlu0 %v384_v3 }
   0x2   :  { %v29_v4 = vmul.f32 2.0, %v25_v0  ;;  %v27_v5 = vmul.f32 2.0, %v23_v1  ;;  %v30_v6 = vmul.f32 2.0, %v26_v2  ;;  %v24_v7 = vld [vmem:[%s490_s1 + $0x8] sm:$0xff]  ;;  %v39_v8 = vmul.f32 4.0, %v23_v1 }
   0x3   :  { %v28_v9 = vmul.f32 2.0, %v24_v7  ;;  %v40_v10 = vmul.f32 4.0, %v24_v7  ;;  %v42_v11 = vmul.f32 4.0, %v26_v2  ;;  %v41_v12 = vmul.f32 4.0, %v25_v0 }
   0x4   :  { %v33_v13 = vmul.f32 %v29_v4, %v25_v0  ;;  %v31_v14 = vmul.f32 %v27_v5, %v23_v1  ;;  %v34_v15 = vmul.f32 %v30_v6, %v26_v2  ;;  %v43_v16 = vmul.f32 %v39_v8, %v23_v1 }
   0x5   :  { %v32_v17 = vmul.f32 %v28_v9, %v24_v7  ;;  %v44_v18 = vmul.f32 %v40_v10, %v24_v7 }
   0x6   :  { %9 = vsyncpa [#allocation3], 0  ;;  %v297_v19 = vadd.f32 -1.0, %v33_v13  ;;  %v295_v20 = vadd.f32 -1.0, %v31_v14  ;;  %v46_v21 = vmul.f32 %v42_v11, %v26_v2  ;;  %v45_v22 = vmul.f32 %v41_v12, %v25_v0  ;;  %v430_v35 = vld [vmem:[%s489_s0 + $0x10] sm:$0xff]  ;;  %v19_v36 = vld [vmem:[%s489_s0] sm:$0xff] }
   0x7   :  { %v298_v23 = vadd.f32 -1.0, %v34_v15  ;;  %v296_v24 = vadd.f32 -1.0, %v32_v17  ;;  %v300_v25 = vadd.f32 -3.0, %v44_v18  ;;  %v299_v26 = vadd.f32 -3.0, %v43_v16  ;;  %v438_v37 = vld [vmem:[%s489_s0 + $0x18] sm:$0xff]  ;;  %v20_v38 = vld [vmem:[%s489_s0 + $0x8] sm:$0xff] }
   0x8   :  { %91 = vperm.xlu1 %327, %v297_v19   ;;  %81 = vperm.xlu0 %326, %v295_v20   ;;  %v302_v29 = vadd.f32 -3.0, %v46_v21  ;;  %v301_v30 = vadd.f32 -3.0, %v45_v22  ;;  %v358_v39 = vld [vmem:[%s491_s2] sm:$0xff]   ;;  %v359_v48 = vld [vmem:[%s491_s2 + $0x8] sm:$0xff]   ;;  %s385_s0 = smov 8   ;;  %s386_s8 = smov 16   ;;  %v348_v58 = vpack.i.bf16 %v20_v38, %v19_v36  ;;  %v353_v60 = vpack.i.bf16 %v438_v37, %v430_v35 }
   0x9   :  { %v52_v27 = vmul.f32 %v300_v25, %v24_v7  ;;  %v51_v28 = vmul.f32 %v299_v26, %v23_v1  ;;  %312 = vmatprep.subr.bf16.mxu0 %v358_v39  ;;  %s387_s2 = smov 24   ;;  %vm175_vm0 = vcmask 64512   ;;  %vm180_vm1 = vcmask 130048   ;;  %s388_s11 = smov [#allocation2]  }
   0xa   :  { %v54_v31 = vmul.f32 %v302_v29, %v26_v2  ;;  %v53_v32 = vmul.f32 %v301_v30, %v25_v0  ;;  %313 = vmatpush3.bf16.msra.mxu0 %v358_v39  ;;  %vm185_vm2 = vcmask 195584   ;;  %vm215_vm3 = vcmask 261120   ;;  %s284_s12 = sshll.u32 %s388_s11, 4  ;;  %s285_s12 = int_to_ptr.vmem [resolvable:$true] %s284_s12 }
   0xb   :  { %314 = vmatprep.subr.bf16.mxu0 %v359_v48  ;;  %p365_p1 = scmp.lt.s32.totalorder %s285_s12, %s285_s12 }
   0xc   :  { %96 = vperm.xlu1 %327, %v298_v23   ;;  %86 = vperm.xlu0 %326, %v296_v24  }
   0xe   :  { %315 = vmatpush3.bf16.msra.mxu0 %v359_v48 }
  0x10   :  { %110 = vperm.xlu1 %327, %v52_v27   ;;  %105 = vperm.xlu0 %326, %v51_v28  }
  0x14   :  { %120 = vperm.xlu1 %327, %v54_v31   ;;  %115 = vperm.xlu0 %326, %v53_v32  }
  0x18   :  { %62 = vperm.xlu1 %327, %v24_v7   ;;  %57 = vperm.xlu0 %326, %v23_v1  }
  0x1c   :  { %72 = vperm.xlu1 %327, %v26_v2   ;;  %67 = vperm.xlu0 %326, %v25_v0  }
  0x87   :  { %v92_v33 = vpop.permute.xlu1 %91  ;;  %v82_v34 = vpop.permute.xlu0 %81 }
  0x88   :  { %v101_v42 = vmul.f32 %v92_v33, %v430_v35  ;;  %v99_v43 = vmul.f32 %v82_v34, %v19_v36 }
  0x8b   :  { %v97_v40 = vpop.permute.xlu1 %96  ;;  %v87_v41 = vpop.permute.xlu0 %86 }
  0x8c   :  { %v102_v44 = vmul.f32 %v97_v40, %v438_v37  ;;  %v100_v45 = vmul.f32 %v87_v41, %v20_v38 }
  0x8e   :  { %v333_v46 = vpack.i.bf16 %v102_v44, %v101_v42  ;;  %v328_v47 = vpack.i.bf16 %v100_v45, %v99_v43 }
  0x8f   :  { %v111_v49 = vpop.permute.xlu1 %110  ;;  %v106_v50 = vpop.permute.xlu0 %105 }
  0x90   :  { %v124_v51 = vmul.f32 %v111_v49, %v20_v38  ;;  %v123_v52 = vmul.f32 %v106_v50, %v19_v36  ;;  %334 = vrot.lane.b32.xlu1 %v333_v46, %s385_s0  ;;  %329 = vrot.lane.b32.xlu0 %v328_v47, %s385_s0 }
  0x92   :  { %v338_v53 = vpack.i.bf16 %v124_v51, %v123_v52 }
  0x93   :  { %v121_v54 = vpop.permute.xlu1 %120  ;;  %v116_v55 = vpop.permute.xlu0 %115 }
  0x94   :  { %v126_v56 = vmul.f32 %v121_v54, %v438_v37  ;;  %v125_v57 = vmul.f32 %v116_v55, %v430_v35  ;;  %339 = vrot.lane.b32.xlu0 %v338_v53, %s386_s8 }
  0x96   :  { %v343_v59 = vpack.i.bf16 %v126_v56, %v125_v57 }
  0x97   :  { %v58_v61 = vpop.permute.xlu0 %57  ;;  %v63_v62 = vpop.permute.xlu1 %62 }
  0x98   :  { %344 = vrot.lane.b32.xlu1 %v343_v59, %s386_s8  ;;  %349 = vrot.lane.b32.xlu0 %v348_v58, %s387_s2  ;;  %v76_v8 = vmul.f32 %v63_v62, %v20_v38  ;;  %v75_v9 = vmul.f32 %v58_v61, %v19_v36 }
  0x9b   :  { %v68_v63 = vpop.permute.xlu0 %67  ;;  %v73_v0 = vpop.permute.xlu1 %72 }
  0x9c   :  { %354 = vrot.lane.b32.xlu1 %v353_v60, %s387_s2  ;;  %v78_v22 = vmul.f32 %v73_v0, %v438_v37  ;;  %v77_v23 = vmul.f32 %v68_v63, %v430_v35  ;;  %v303_v37 = vld [vmem:[%s492_s3] ss:$0 sm:$0xff]  ;;  %s360_s3 = scalar_lea.vmem %s285_s12, 512 }
  0x9d   :  { %p361_p0 = scmp.ne.s32.totalorder %s285_s12, %s360_s3  ;;  %p366_p2 = scmp.lt.s32.totalorder %s360_s3, %s360_s3 }
  0x9f   :  { %p367_p3 = por %p366_p2, %p365_p1 }
  0xa1   :  { %p368_p4 = pnand %p367_p3, %p361_p0 }
 0x102   :  { %v330_v1 = vpop.permute.xlu0 %329  ;;  %v335_v2 = vpop.permute.xlu1 %334 }
 0x103   :  { %v332_v4 = vunpack.i.h.bf16 %v330_v1  ;;  %v331_v5 = vunpack.i.l.bf16 %v330_v1  ;;  %v337_v10 = vunpack.i.h.bf16 %v335_v2  ;;  %v336_v11 = vunpack.i.l.bf16 %v335_v2 }
 0x105   :  { %v177_v14 = vsel %vm175_vm0, %v76_v8, %v332_v4  ;;  %v176_v15 = vsel %vm175_vm0, %v75_v9, %v331_v5  ;;  %v179_v28 = vsel %vm175_vm0, %v78_v22, %v337_v10  ;;  %v178_v29 = vsel %vm175_vm0, %v77_v23, %v336_v11 }
 0x106   :  { %v340_v3 = vpop.permute.xlu0 %339 }
 0x107   :  { %v342_v6 = vunpack.i.h.bf16 %v340_v3  ;;  %v341_v7 = vunpack.i.l.bf16 %v340_v3 }
 0x109   :  { %v181_v20 = vsel %vm180_vm1, %v176_v15, %v341_v7  ;;  %v182_v21 = vsel %vm180_vm1, %v177_v14, %v342_v6 }
 0x10a   :  { %v345_v12 = vpop.permute.xlu1 %344  ;;  %v350_v13 = vpop.permute.xlu0 %349 }
 0x10b   :  { %v352_v16 = vunpack.i.h.bf16 %v350_v13  ;;  %v351_v17 = vunpack.i.l.bf16 %v350_v13  ;;  %v347_v18 = vunpack.i.h.bf16 %v345_v12  ;;  %v346_v19 = vunpack.i.l.bf16 %v345_v12 }
 0x10d   :  { %v186_v24 = vsel %vm185_vm2, %v181_v20, %v351_v17  ;;  %v187_v25 = vsel %vm185_vm2, %v182_v21, %v352_v16  ;;  %v183_v32 = vsel %vm180_vm1, %v178_v29, %v346_v19  ;;  %v184_v33 = vsel %vm180_vm1, %v179_v28, %v347_v18 }
 0x10e   :  { %v355_v26 = vpop.permute.xlu1 %354  ;;  %v190_v27 = vpack.c.bf16 %v187_v25, %v186_v24 }
 0x10f   :  { %v357_v30 = vunpack.i.h.bf16 %v355_v26  ;;  %v356_v31 = vunpack.i.l.bf16 %v355_v26 }
 0x110   :  { %316 = vmatprep.mubr.msk.bf16.mxu0 %vm215_vm3, %v190_v27 }
 0x111   :  { %v188_v34 = vsel %vm185_vm2, %v183_v32, %v356_v31  ;;  %v189_v35 = vsel %vm185_vm2, %v184_v33, %v357_v30 }
 0x112   :  { %v191_v36 = vpack.c.bf16 %v189_v35, %v188_v34 }
 0x114   :  { %317 = vmatmul.mubr.msk.bf16.vlgmr.msra.gmra.mrb[0].mxu0 %vm215_vm3, %v191_v36 }
 0x1e7   :  { %v318_v38 = vpop.f32.mrb[0].mxu0 }
 0x1e8   :  { %v265_v39 = vadd.f32 %v318_v38, %v303_v37  ;;  %v256_v40 = vpop.f32.mrb[1].mxu0 }
 0x1e9   :  { %v257_v41 = vadd.f32 %v303_v37, %v256_v40  ;;  %v319_v42 = vpop.f32.mrb[2].mxu0 }
 0x1ea   :  { %v273_v43 = vmax.f32 %v265_v39, 0.0  ;;  %v268_v44 = vadd.f32 %v319_v42, %v303_v37  ;;  %v259_v45 = vpop.f32.mrb[3].mxu0 }
 0x1eb   :  { %v271_v46 = vmax.f32 %v257_v41, 0.0  ;;  %v260_v47 = vadd.f32 %v303_v37, %v259_v45 }
 0x1ec   :  { %277 = vst [vmem:[#allocation2 + $0x10] sm:$0xff] %v273_v43  ;;  %v274_v48 = vmax.f32 %v268_v44, 0.0 }
 0x1ed   :  { %275 = vst [vmem:[#allocation2] sm:$0xff] %v271_v46  ;;  %v272_v49 = vmax.f32 %v260_v47, 0.0 }
 0x1ee   :  { %278 = vst [vmem:[#allocation2 + $0x18] sm:$0xff] %v274_v48 }
 0x1ef   :  { %276 = vst [vmem:[#allocation2 + $0x8] sm:$0xff] %v272_v49 }
 0x1f0   :  { %371 = shalt.err (!%p368_p4)
}
 0x1f1   :  { %s372_s15 = scalar_lea.hbm %s493_s4, 512 }
 0x1f2   :  { %p373_p5 = scmp.ne.s32.totalorder %s493_s4, %s372_s15  ;;  %p376_p6 = scmp.lt.u32.totalorder %s372_s15, %s493_s4 }
 0x1f4   :  { %p378_p7 = pnand %p376_p6, %p373_p5 }
 0x1f6   :  { %381 = shalt.err (!%p378_p7)
}
 0x1f7   :  { %s389_s20 = smov 128  }
 0x1f8   :  { %290 = dma.vmem_to_hbm [thread:$0]  %s285_s12, 512, %s493_s4, [#allocation3], %s389_s20, %s389_s20, %s385_s0  }
 0x1f9   :  { %382 = dma.done.wait [#allocation3], 512  }
 0x1fa   :  { %383 = vsyncadd [#allocation3], 4294966784 }
 0x1fb   :  { %294 = vsyncpa [#allocation3], 1 }

</bundles_post_ra>
